<compile_context>
chip_gen: v5e
topology: v5e:2x2
jax: 0.10.0
libtpu: 0.0.40
codegen_flags: <defaults>
</compile_context>

<pallas_src>
import jax
import jax.numpy as jnp
from jax import lax
from jax.experimental import pallas as pl
from jax.experimental.pallas import tpu as pltpu

D_MODEL = 32
N_HEADS = 8
HEAD_DIM = D_MODEL // N_HEADS      # 4
D_PAD = 128                        # padded residual-stream width (lane-dense stores)
D_FF = 4 * D_MODEL                 # 128 -- already lane-dense
EPS = 1e-5


def _masked_layernorm(x, gamma, beta, colmask):
    """LayerNorm over the first D_MODEL columns of a (N, D_PAD) slab.

    Requires columns D_MODEL..D_PAD-1 of x, gamma, beta to be exactly zero; then the
    padded output columns stay exactly zero (keeps the padding invariant)."""
    inv_d = 1.0 / D_MODEL
    mean = jnp.sum(x, axis=-1, keepdims=True) * inv_d      # pads are zero -> exact mean
    xc = x - mean * colmask                                 # padded columns remain zero
    var = jnp.sum(xc * xc, axis=-1, keepdims=True) * inv_d  # two-pass variance (no E[x^2]-m^2)
    return xc * lax.rsqrt(var + EPS) * gamma + beta


def transformer_kernel(
    x_ref,                    # (BS, D_PAD)         residual stream, cols >= 32 are zero
    wqkv_ref, bqkv_ref,       # (D_PAD, 96), (1, 96)   [softmax scale folded into Q cols]
    headmask_ref,             # (H*BS, D_MODEL)     headmask[r, c] = (c//hd == r//BS)
    batchmask_ref,            # (BS, H*BS)          same-batch mask for the score columns
    colmask_ref,              # (1, D_PAD)          first D_MODEL columns = 1
    wo_ref, bo_ref,           # (D_MODEL, D_PAD), (1, D_PAD)
    g1_ref, be1_ref,          # (1, D_PAD) x2
    w1_ref, b1_ref,           # (D_PAD, D_FF), (1, D_FF)
    w2_ref, b2_ref,           # (D_FF, D_PAD), (1, D_PAD)
    g2_ref, be2_ref,          # (1, D_PAD) x2
    out_ref,                  # (BS, D_PAD)
):
    x = x_ref[...]
    colmask = colmask_ref[...]

    # ---- fused QKV projection: one matmul over all B*S rows (128-wide contraction) ----
    qkv = jnp.dot(x, wqkv_ref[...],
                  preferred_element_type=jnp.float32) + bqkv_ref[...]      # (BS, 96)
    q = qkv[:, :D_MODEL]
    k = qkv[:, D_MODEL:2 * D_MODEL]
    v = qkv[:, 2 * D_MODEL:3 * D_MODEL]

    # ---- block-diagonal head expansion: row r = h*BS + t holds token t's K/V restricted
    #      to head h's columns.  Sublane-aligned concat + one mask multiply; no per-head
    #      gather, no scratch, no transpose. ----
    headmask = headmask_ref[...]                                           # (H*BS, 32)
    kexp = jnp.concatenate([k] * N_HEADS, axis=0) * headmask               # (H*BS, 32)
    vexp = jnp.concatenate([v] * N_HEADS, axis=0) * headmask               # (H*BS, 32)

    # scores[i, h*BS + t] = <q_i, k_t> restricted to head h (scale pre-folded into Wq).
    # K is consumed "pre-transposed" by contracting both minor dims (trans-B form).
    s = lax.dot_general(q, kexp, (((1,), (1,)), ((), ())),
                        preferred_element_type=jnp.float32)                # (BS, H*BS)

    # per-(row, head)-block softmax: subtracting the global row max is exact for every
    # block (per-row constant); cross-batch columns are zeroed multiplicatively.
    p = jnp.exp(s - jnp.max(s, axis=-1, keepdims=True)) * batchmask_ref[...]
    den = jnp.dot(p, headmask, preferred_element_type=jnp.float32)         # block sums, (BS, 32)
    ctx = jnp.dot(p, vexp, preferred_element_type=jnp.float32) / den       # merged heads, (BS, 32)

    # ---- output projection (head merge already done by the block-diagonal PV matmul) ----
    attn = jnp.dot(ctx, wo_ref[...],
                   preferred_element_type=jnp.float32) + bo_ref[...]       # (BS, D_PAD)

    # ---- residual + LayerNorm 1 ----
    x1 = _masked_layernorm(x + attn, g1_ref[...], be1_ref[...], colmask)

    # ---- MLP: Linear -> ReLU -> Linear ----
    h1 = jnp.dot(x1, w1_ref[...], preferred_element_type=jnp.float32) + b1_ref[...]
    h1 = jnp.maximum(h1, 0.0)
    mlp = jnp.dot(h1, w2_ref[...], preferred_element_type=jnp.float32) + b2_ref[...]

    # ---- residual + LayerNorm 2, lane-dense (BS, 128) store ----
    out_ref[...] = _masked_layernorm(x1 + mlp, g2_ref[...], be2_ref[...], colmask)


def transformer_layer(x, padded):
    B, S, D = x.shape
    assert D == D_MODEL
    BS = B * S
    HBS = N_HEADS * BS
    x_pad = jnp.pad(x.reshape(BS, D).astype(jnp.float32), ((0, 0), (0, D_PAD - D)))

    # shape-dependent constant masks (head-block / batch-block structure of the expanded
    # score columns) -- built once in the wrapper, DMA'd as tiny f32 operands.
    r = jnp.arange(HBS)
    headmask = (jnp.arange(D_MODEL)[None, :] // HEAD_DIM
                == (r[:, None] // BS)).astype(jnp.float32)                 # (HBS, 32)
    batchmask = (((r[None, :] // S) % B)
                 == (jnp.arange(BS)[:, None] // S)).astype(jnp.float32)    # (BS, HBS)
    colmask = (jnp.arange(D_PAD) < D_MODEL).astype(jnp.float32)[None, :]   # (1, D_PAD)

    ops = [
        x_pad,
        padded["wqkv"], padded["bqkv"],
        headmask, batchmask, colmask,
        padded["wo"], padded["bo"],
        padded["g1"], padded["be1"],
        padded["w1"], padded["b1"],
        padded["w2"], padded["b2"],
        padded["g2"], padded["be2"],
    ]
    in_specs = [pl.BlockSpec(o.shape, lambda i: (0, 0)) for o in ops]

    grid_spec = pltpu.PrefetchScalarGridSpec(
        num_scalar_prefetch=0,
        grid=(1,),                                  # whole folded batch in one step
        in_specs=in_specs,
        out_specs=pl.BlockSpec((BS, D_PAD), lambda i: (0, 0)),
    )
    out_pad = pl.pallas_call(
        transformer_kernel,
        out_shape=jax.ShapeDtypeStruct((BS, D_PAD), jnp.float32),
        grid_spec=grid_spec,
        compiler_params=pltpu.CompilerParams(dimension_semantics=("arbitrary",)),
    )(*ops)
    return out_pad[:, :D_MODEL].reshape(B, S, D_MODEL)


# ---------------------------------------------------------------------------
# Parameter construction (PyTorch-convention raw params) and wrapper-side padding.
# ---------------------------------------------------------------------------

def init_raw_params(key):
    ks = jax.random.split(key, 8)
    sc = 0.02
    return {
        "in_w":  jax.random.normal(ks[0], (3 * D_MODEL, D_MODEL), jnp.float32) * sc,
        "in_b":  jax.random.normal(ks[1], (3 * D_MODEL,), jnp.float32) * sc,
        "out_w": jax.random.normal(ks[2], (D_MODEL, D_MODEL), jnp.float32) * sc,
        "out_b": jax.random.normal(ks[3], (D_MODEL,), jnp.float32) * sc,
        "w1":    jax.random.normal(ks[4], (D_FF, D_MODEL), jnp.float32) * sc,
        "b1":    jax.random.normal(ks[5], (D_FF,), jnp.float32) * sc,
        "w2":    jax.random.normal(ks[6], (D_MODEL, D_FF), jnp.float32) * sc,
        "b2":    jax.random.normal(ks[7], (D_MODEL,), jnp.float32) * sc,
        "g1":  jnp.ones((D_MODEL,), jnp.float32),   # LayerNorm defaults
        "be1": jnp.zeros((D_MODEL,), jnp.float32),
        "g2":  jnp.ones((D_MODEL,), jnp.float32),
        "be2": jnp.zeros((D_MODEL,), jnp.float32),
    }


def pad_params(p):
    """Kernel operands: transposed to (in, out), zero-padded only where they touch the
    128-wide residual stream; no head-dim padding.  Softmax 1/sqrt(hd) is folded into
    the Q projection columns."""
    scale = 1.0 / (HEAD_DIM ** 0.5)

    def pad2(w, rows, cols):
        return jnp.pad(w, ((0, rows - w.shape[0]), (0, cols - w.shape[1])))

    def pad_row(v, cols):
        return jnp.pad(v, (0, cols - v.shape[0])).reshape(1, cols)

    wq = p["in_w"][:D_MODEL].T * scale                     # (32, 32), scale folded
    wk = p["in_w"][D_MODEL:2 * D_MODEL].T
    wv = p["in_w"][2 * D_MODEL:].T
    wqkv = pad2(jnp.concatenate([wq, wk, wv], axis=1), D_PAD, 3 * D_MODEL)   # (128, 96)
    bqkv = jnp.concatenate([p["in_b"][:D_MODEL] * scale,
                            p["in_b"][D_MODEL:2 * D_MODEL],
                            p["in_b"][2 * D_MODEL:]]).reshape(1, 3 * D_MODEL)

    return {
        "wqkv": wqkv, "bqkv": bqkv,
        "wo": pad2(p["out_w"].T, D_MODEL, D_PAD), "bo": pad_row(p["out_b"], D_PAD),
        "g1": pad_row(p["g1"], D_PAD), "be1": pad_row(p["be1"], D_PAD),
        "w1": pad2(p["w1"].T, D_PAD, D_FF), "b1": p["b1"].reshape(1, D_FF),
        "w2": pad2(p["w2"].T, D_FF, D_PAD), "b2": pad_row(p["b2"], D_PAD),
        "g2": pad_row(p["g2"], D_PAD), "be2": pad_row(p["be2"], D_PAD),
    }


# ---------------------------------------------------------------------------
# Pure-JAX reference mirroring torch.nn.MultiheadAttention / LayerNorm / MLP.
# ---------------------------------------------------------------------------

def _layernorm_ref(x, gamma, beta):
    mean = jnp.mean(x, axis=-1, keepdims=True)
    var = jnp.mean((x - mean) ** 2, axis=-1, keepdims=True)
    return (x - mean) * lax.rsqrt(var + EPS) * gamma + beta


def reference(x, p):
    wq, wk, wv = p["in_w"][:D_MODEL], p["in_w"][D_MODEL:2 * D_MODEL], p["in_w"][2 * D_MODEL:]
    bq, bk, bv = p["in_b"][:D_MODEL], p["in_b"][D_MODEL:2 * D_MODEL], p["in_b"][2 * D_MODEL:]

    def one(xb):
        q = xb @ wq.T + bq
        k = xb @ wk.T + bk
        v = xb @ wv.T + bv
        outs = []
        for h in range(N_HEADS):
            sl = slice(h * HEAD_DIM, (h + 1) * HEAD_DIM)
            sc = (q[:, sl] / (HEAD_DIM ** 0.5)) @ k[:, sl].T
            a = jax.nn.softmax(sc, axis=-1)
            outs.append(a @ v[:, sl])
        attn = jnp.concatenate(outs, axis=-1) @ p["out_w"].T + p["out_b"]
        x1 = _layernorm_ref(xb + attn, p["g1"], p["be1"])
        h1 = jnp.maximum(x1 @ p["w1"].T + p["b1"], 0.0)
        mlp = h1 @ p["w2"].T + p["b2"]
        return _layernorm_ref(x1 + mlp, p["g2"], p["be2"])

    return jax.vmap(one)(x)


if __name__ == "__main__":
    key = jax.random.PRNGKey(0)
    kx, kp = jax.random.split(key)
    B, S = 2, 8
    x = jax.random.normal(kx, (B, S, D_MODEL), jnp.float32)

    raw = init_raw_params(kp)
    padded = pad_params(raw)

    out = transformer_layer(x, padded)
    out = jax.block_until_ready(out)

    ref = reference(x, raw)
    assert out.shape == (B, S, D_MODEL)
    assert jnp.allclose(out, ref, atol=1e-4, rtol=1e-4), "mismatch vs pure-JAX reference"
    print("KERNEL_OK")
</pallas_src>

<mosaic_0001>
module attributes {stable_mosaic.version = 11 : i64} {
  func.func @transformer_kernel(%arg0: i32, %arg1: memref<16x128xf32, #tpu.memory_space<vmem>>, %arg2: memref<128x96xf32, #tpu.memory_space<vmem>>, %arg3: memref<1x96xf32, #tpu.memory_space<vmem>>, %arg4: memref<128x32xf32, #tpu.memory_space<vmem>>, %arg5: memref<16x128xf32, #tpu.memory_space<vmem>>, %arg6: memref<1x128xf32, #tpu.memory_space<vmem>>, %arg7: memref<32x128xf32, #tpu.memory_space<vmem>>, %arg8: memref<1x128xf32, #tpu.memory_space<vmem>>, %arg9: memref<1x128xf32, #tpu.memory_space<vmem>>, %arg10: memref<1x128xf32, #tpu.memory_space<vmem>>, %arg11: memref<128x128xf32, #tpu.memory_space<vmem>>, %arg12: memref<1x128xf32, #tpu.memory_space<vmem>>, %arg13: memref<128x128xf32, #tpu.memory_space<vmem>>, %arg14: memref<1x128xf32, #tpu.memory_space<vmem>>, %arg15: memref<1x128xf32, #tpu.memory_space<vmem>>, %arg16: memref<1x128xf32, #tpu.memory_space<vmem>>, %arg17: memref<16x128xf32, #tpu.memory_space<vmem>>) attributes {dimension_semantics = [#tpu.dimension_semantics<arbitrary>], iteration_bounds = array<i64: 1>, scalar_prefetch = 0 : i64, scratch_operands = 0 : i64, tpu.core_type = #tpu.core_type<tc>, window_params = [{pipeline_mode = #tpu.pipeline_mode<synchronous>, transform_indices = @transform_0, window_bounds = array<i64: 16, 128>}, {pipeline_mode = #tpu.pipeline_mode<synchronous>, transform_indices = @transform_1, window_bounds = array<i64: 128, 96>}, {pipeline_mode = #tpu.pipeline_mode<synchronous>, transform_indices = @transform_2, window_bounds = array<i64: 1, 96>}, {pipeline_mode = #tpu.pipeline_mode<synchronous>, transform_indices = @transform_3, window_bounds = array<i64: 128, 32>}, {pipeline_mode = #tpu.pipeline_mode<synchronous>, transform_indices = @transform_4, window_bounds = array<i64: 16, 128>}, {pipeline_mode = #tpu.pipeline_mode<synchronous>, transform_indices = @transform_5, window_bounds = array<i64: 1, 128>}, {pipeline_mode = #tpu.pipeline_mode<synchronous>, transform_indices = @transform_6, window_bounds = array<i64: 32, 128>}, {pipeline_mode = #tpu.pipeline_mode<synchronous>, transform_indices = @transform_7, window_bounds = array<i64: 1, 128>}, {pipeline_mode = #tpu.pipeline_mode<synchronous>, transform_indices = @transform_8, window_bounds = array<i64: 1, 128>}, {pipeline_mode = #tpu.pipeline_mode<synchronous>, transform_indices = @transform_9, window_bounds = array<i64: 1, 128>}, {pipeline_mode = #tpu.pipeline_mode<synchronous>, transform_indices = @transform_10, window_bounds = array<i64: 128, 128>}, {pipeline_mode = #tpu.pipeline_mode<synchronous>, transform_indices = @transform_11, window_bounds = array<i64: 1, 128>}, {pipeline_mode = #tpu.pipeline_mode<synchronous>, transform_indices = @transform_12, window_bounds = array<i64: 128, 128>}, {pipeline_mode = #tpu.pipeline_mode<synchronous>, transform_indices = @transform_13, window_bounds = array<i64: 1, 128>}, {pipeline_mode = #tpu.pipeline_mode<synchronous>, transform_indices = @transform_14, window_bounds = array<i64: 1, 128>}, {pipeline_mode = #tpu.pipeline_mode<synchronous>, transform_indices = @transform_15, window_bounds = array<i64: 1, 128>}, {pipeline_mode = #tpu.pipeline_mode<synchronous>, transform_indices = @transform_16, window_bounds = array<i64: 16, 128>}]} {
    %c0 = arith.constant 0 : index
    %c0_0 = arith.constant 0 : index
    %0 = vector.load %arg1[%c0, %c0_0] : memref<16x128xf32, #tpu.memory_space<vmem>>, vector<16x128xf32>
    %c0_1 = arith.constant 0 : index
    %c0_2 = arith.constant 0 : index
    %1 = vector.load %arg6[%c0_1, %c0_2] : memref<1x128xf32, #tpu.memory_space<vmem>>, vector<1x128xf32>
    %c0_3 = arith.constant 0 : index
    %c0_4 = arith.constant 0 : index
    %2 = vector.load %arg2[%c0_3, %c0_4] : memref<128x96xf32, #tpu.memory_space<vmem>>, vector<128x96xf32>
    %cst = arith.constant dense<0.000000e+00> : vector<16x96xf32>
    %3 = tpu.matmul %0, %2, %cst {dimension_numbers = #tpu.dot_dimension_numbers<[1], [0], [0], [1], [0, 0, 1, 1], [], []>} : vector<16x128xf32>, vector<128x96xf32>, vector<16x96xf32> -> vector<16x96xf32>
    %c0_5 = arith.constant 0 : index
    %c0_6 = arith.constant 0 : index
    %4 = vector.load %arg3[%c0_5, %c0_6] : memref<1x96xf32, #tpu.memory_space<vmem>>, vector<1x96xf32>
    %5 = vector.broadcast %4 : vector<1x96xf32> to vector<16x96xf32>
    %6 = arith.addf %3, %5 : vector<16x96xf32>
    %7 = vector.extract_strided_slice %6 {offsets = [0, 0], sizes = [16, 32], strides = [1, 1]} : vector<16x96xf32> to vector<16x32xf32>
    %8 = vector.extract_strided_slice %6 {offsets = [0, 32], sizes = [16, 32], strides = [1, 1]} : vector<16x96xf32> to vector<16x32xf32>
    %9 = vector.extract_strided_slice %6 {offsets = [0, 64], sizes = [16, 32], strides = [1, 1]} : vector<16x96xf32> to vector<16x32xf32>
    %c0_7 = arith.constant 0 : index
    %c0_8 = arith.constant 0 : index
    %10 = vector.load %arg4[%c0_7, %c0_8] : memref<128x32xf32, #tpu.memory_space<vmem>>, vector<128x32xf32>
    %11 = tpu.concatenate %8, %8, %8, %8, %8, %8, %8, %8 in 0 : vector<16x32xf32>, vector<16x32xf32>, vector<16x32xf32>, vector<16x32xf32>, vector<16x32xf32>, vector<16x32xf32>, vector<16x32xf32>, vector<16x32xf32> -> vector<128x32xf32>
    %12 = arith.mulf %11, %10 : vector<128x32xf32>
    %13 = tpu.concatenate %9, %9, %9, %9, %9, %9, %9, %9 in 0 : vector<16x32xf32>, vector<16x32xf32>, vector<16x32xf32>, vector<16x32xf32>, vector<16x32xf32>, vector<16x32xf32>, vector<16x32xf32>, vector<16x32xf32> -> vector<128x32xf32>
    %14 = arith.mulf %13, %10 : vector<128x32xf32>
    %cst_9 = arith.constant dense<0.000000e+00> : vector<16x128xf32>
    %15 = tpu.matmul %7, %12, %cst_9 {dimension_numbers = #tpu.dot_dimension_numbers<[1], [1], [0], [0], [0, 0, 1, 0], [], []>} : vector<16x32xf32>, vector<128x32xf32>, vector<16x128xf32> -> vector<16x128xf32>
    %cst_10 = arith.constant dense<0xFF800000> : vector<16xf32>
    %16 = vector.multi_reduction <maximumf>, %15, %cst_10 [1] : vector<16x128xf32> to vector<16xf32>
    %17 = vector.shape_cast %16 : vector<16xf32> to vector<16x1xf32>
    %18 = vector.broadcast %17 : vector<16x1xf32> to vector<16x128xf32>
    %19 = arith.subf %15, %18 : vector<16x128xf32>
    %20 = math.exp %19 : vector<16x128xf32>
    %c0_11 = arith.constant 0 : index
    %c0_12 = arith.constant 0 : index
    %21 = vector.load %arg5[%c0_11, %c0_12] : memref<16x128xf32, #tpu.memory_space<vmem>>, vector<16x128xf32>
    %22 = arith.mulf %20, %21 : vector<16x128xf32>
    %cst_13 = arith.constant dense<0.000000e+00> : vector<16x32xf32>
    %23 = tpu.matmul %22, %10, %cst_13 {dimension_numbers = #tpu.dot_dimension_numbers<[1], [0], [0], [1], [0, 0, 1, 1], [], []>} : vector<16x128xf32>, vector<128x32xf32>, vector<16x32xf32> -> vector<16x32xf32>
    %cst_14 = arith.constant dense<0.000000e+00> : vector<16x32xf32>
    %24 = tpu.matmul %22, %14, %cst_14 {dimension_numbers = #tpu.dot_dimension_numbers<[1], [0], [0], [1], [0, 0, 1, 1], [], []>} : vector<16x128xf32>, vector<128x32xf32>, vector<16x32xf32> -> vector<16x32xf32>
    %25 = arith.divf %24, %23 : vector<16x32xf32>
    %c0_15 = arith.constant 0 : index
    %c0_16 = arith.constant 0 : index
    %26 = vector.load %arg7[%c0_15, %c0_16] : memref<32x128xf32, #tpu.memory_space<vmem>>, vector<32x128xf32>
    %cst_17 = arith.constant dense<0.000000e+00> : vector<16x128xf32>
    %27 = tpu.matmul %25, %26, %cst_17 {dimension_numbers = #tpu.dot_dimension_numbers<[1], [0], [0], [1], [0, 0, 1, 1], [], []>} : vector<16x32xf32>, vector<32x128xf32>, vector<16x128xf32> -> vector<16x128xf32>
    %c0_18 = arith.constant 0 : index
    %c0_19 = arith.constant 0 : index
    %28 = vector.load %arg8[%c0_18, %c0_19] : memref<1x128xf32, #tpu.memory_space<vmem>>, vector<1x128xf32>
    %29 = vector.broadcast %28 : vector<1x128xf32> to vector<16x128xf32>
    %30 = arith.addf %27, %29 : vector<16x128xf32>
    %31 = arith.addf %0, %30 : vector<16x128xf32>
    %c0_20 = arith.constant 0 : index
    %c0_21 = arith.constant 0 : index
    %32 = vector.load %arg9[%c0_20, %c0_21] : memref<1x128xf32, #tpu.memory_space<vmem>>, vector<1x128xf32>
    %c0_22 = arith.constant 0 : index
    %c0_23 = arith.constant 0 : index
    %33 = vector.load %arg10[%c0_22, %c0_23] : memref<1x128xf32, #tpu.memory_space<vmem>>, vector<1x128xf32>
    %cst_24 = arith.constant dense<0.000000e+00> : vector<16xf32>
    %34 = vector.multi_reduction <add>, %31, %cst_24 [1] : vector<16x128xf32> to vector<16xf32>
    %35 = vector.shape_cast %34 : vector<16xf32> to vector<16x1xf32>
    %cst_25 = arith.constant 3.125000e-02 : f32
    %36 = vector.broadcast %cst_25 : f32 to vector<16x1xf32>
    %37 = arith.mulf %35, %36 : vector<16x1xf32>
    %38 = vector.broadcast %37 : vector<16x1xf32> to vector<16x128xf32>
    %39 = vector.broadcast %1 : vector<1x128xf32> to vector<16x128xf32>
    %40 = arith.mulf %38, %39 : vector<16x128xf32>
    %41 = arith.subf %31, %40 : vector<16x128xf32>
    %42 = arith.mulf %41, %41 : vector<16x128xf32>
    %cst_26 = arith.constant dense<0.000000e+00> : vector<16xf32>
    %43 = vector.multi_reduction <add>, %42, %cst_26 [1] : vector<16x128xf32> to vector<16xf32>
    %44 = vector.shape_cast %43 : vector<16xf32> to vector<16x1xf32>
    %cst_27 = arith.constant 3.125000e-02 : f32
    %45 = vector.broadcast %cst_27 : f32 to vector<16x1xf32>
    %46 = arith.mulf %44, %45 : vector<16x1xf32>
    %cst_28 = arith.constant 9.99999974E-6 : f32
    %47 = vector.broadcast %cst_28 : f32 to vector<16x1xf32>
    %48 = arith.addf %46, %47 : vector<16x1xf32>
    %49 = math.rsqrt %48 : vector<16x1xf32>
    %50 = vector.broadcast %49 : vector<16x1xf32> to vector<16x128xf32>
    %51 = arith.mulf %41, %50 : vector<16x128xf32>
    %52 = vector.broadcast %32 : vector<1x128xf32> to vector<16x128xf32>
    %53 = arith.mulf %51, %52 : vector<16x128xf32>
    %54 = vector.broadcast %33 : vector<1x128xf32> to vector<16x128xf32>
    %55 = arith.addf %53, %54 : vector<16x128xf32>
    %c0_29 = arith.constant 0 : index
    %c0_30 = arith.constant 0 : index
    %56 = vector.load %arg11[%c0_29, %c0_30] : memref<128x128xf32, #tpu.memory_space<vmem>>, vector<128x128xf32>
    %cst_31 = arith.constant dense<0.000000e+00> : vector<16x128xf32>
    %57 = tpu.matmul %55, %56, %cst_31 {dimension_numbers = #tpu.dot_dimension_numbers<[1], [0], [0], [1], [0, 0, 1, 1], [], []>} : vector<16x128xf32>, vector<128x128xf32>, vector<16x128xf32> -> vector<16x128xf32>
    %c0_32 = arith.constant 0 : index
    %c0_33 = arith.constant 0 : index
    %58 = vector.load %arg12[%c0_32, %c0_33] : memref<1x128xf32, #tpu.memory_space<vmem>>, vector<1x128xf32>
    %59 = vector.broadcast %58 : vector<1x128xf32> to vector<16x128xf32>
    %60 = arith.addf %57, %59 : vector<16x128xf32>
    %cst_34 = arith.constant 0.000000e+00 : f32
    %61 = vector.broadcast %cst_34 : f32 to vector<16x128xf32>
    %62 = arith.maximumf %60, %61 : vector<16x128xf32>
    %c0_35 = arith.constant 0 : index
    %c0_36 = arith.constant 0 : index
    %63 = vector.load %arg13[%c0_35, %c0_36] : memref<128x128xf32, #tpu.memory_space<vmem>>, vector<128x128xf32>
    %cst_37 = arith.constant dense<0.000000e+00> : vector<16x128xf32>
    %64 = tpu.matmul %62, %63, %cst_37 {dimension_numbers = #tpu.dot_dimension_numbers<[1], [0], [0], [1], [0, 0, 1, 1], [], []>} : vector<16x128xf32>, vector<128x128xf32>, vector<16x128xf32> -> vector<16x128xf32>
    %c0_38 = arith.constant 0 : index
    %c0_39 = arith.constant 0 : index
    %65 = vector.load %arg14[%c0_38, %c0_39] : memref<1x128xf32, #tpu.memory_space<vmem>>, vector<1x128xf32>
    %66 = vector.broadcast %65 : vector<1x128xf32> to vector<16x128xf32>
    %67 = arith.addf %64, %66 : vector<16x128xf32>
    %68 = arith.addf %55, %67 : vector<16x128xf32>
    %c0_40 = arith.constant 0 : index
    %c0_41 = arith.constant 0 : index
    %69 = vector.load %arg15[%c0_40, %c0_41] : memref<1x128xf32, #tpu.memory_space<vmem>>, vector<1x128xf32>
    %c0_42 = arith.constant 0 : index
    %c0_43 = arith.constant 0 : index
    %70 = vector.load %arg16[%c0_42, %c0_43] : memref<1x128xf32, #tpu.memory_space<vmem>>, vector<1x128xf32>
    %cst_44 = arith.constant dense<0.000000e+00> : vector<16xf32>
    %71 = vector.multi_reduction <add>, %68, %cst_44 [1] : vector<16x128xf32> to vector<16xf32>
    %72 = vector.shape_cast %71 : vector<16xf32> to vector<16x1xf32>
    %cst_45 = arith.constant 3.125000e-02 : f32
    %73 = vector.broadcast %cst_45 : f32 to vector<16x1xf32>
    %74 = arith.mulf %72, %73 : vector<16x1xf32>
    %75 = vector.broadcast %74 : vector<16x1xf32> to vector<16x128xf32>
    %76 = vector.broadcast %1 : vector<1x128xf32> to vector<16x128xf32>
    %77 = arith.mulf %75, %76 : vector<16x128xf32>
    %78 = arith.subf %68, %77 : vector<16x128xf32>
    %79 = arith.mulf %78, %78 : vector<16x128xf32>
    %cst_46 = arith.constant dense<0.000000e+00> : vector<16xf32>
    %80 = vector.multi_reduction <add>, %79, %cst_46 [1] : vector<16x128xf32> to vector<16xf32>
    %81 = vector.shape_cast %80 : vector<16xf32> to vector<16x1xf32>
    %cst_47 = arith.constant 3.125000e-02 : f32
    %82 = vector.broadcast %cst_47 : f32 to vector<16x1xf32>
    %83 = arith.mulf %81, %82 : vector<16x1xf32>
    %cst_48 = arith.constant 9.99999974E-6 : f32
    %84 = vector.broadcast %cst_48 : f32 to vector<16x1xf32>
    %85 = arith.addf %83, %84 : vector<16x1xf32>
    %86 = math.rsqrt %85 : vector<16x1xf32>
    %87 = vector.broadcast %86 : vector<16x1xf32> to vector<16x128xf32>
    %88 = arith.mulf %78, %87 : vector<16x128xf32>
    %89 = vector.broadcast %69 : vector<1x128xf32> to vector<16x128xf32>
    %90 = arith.mulf %88, %89 : vector<16x128xf32>
    %91 = vector.broadcast %70 : vector<1x128xf32> to vector<16x128xf32>
    %92 = arith.addf %90, %91 : vector<16x128xf32>
    %c0_49 = arith.constant 0 : index
    %c0_50 = arith.constant 0 : index
    %93 = vector.load %arg17[%c0_49, %c0_50] : memref<16x128xf32, #tpu.memory_space<vmem>>, vector<16x128xf32>
    tpu.vector_store %arg17[%c0_49, %c0_50], %92 {strides = array<i32>} : memref<16x128xf32, #tpu.memory_space<vmem>>, vector<16x128xf32>,
    return
  }
  func.func @transform_0(%arg0: i32) -> (i32, i32) {
    %c0_i32 = arith.constant 0 : i32
    %c0_i32_0 = arith.constant 0 : i32
    %c0_i32_1 = arith.constant 0 : i32
    return %c0_i32, %c0_i32_0 : i32, i32
  }
  func.func @transform_1(%arg0: i32) -> (i32, i32) {
    %c0_i32 = arith.constant 0 : i32
    %c0_i32_0 = arith.constant 0 : i32
    %c0_i32_1 = arith.constant 0 : i32
    return %c0_i32, %c0_i32_0 : i32, i32
  }
  func.func @transform_2(%arg0: i32) -> (i32, i32) {
    %c0_i32 = arith.constant 0 : i32
    %c0_i32_0 = arith.constant 0 : i32
    %c0_i32_1 = arith.constant 0 : i32
    return %c0_i32, %c0_i32_0 : i32, i32
  }
  func.func @transform_3(%arg0: i32) -> (i32, i32) {
    %c0_i32 = arith.constant 0 : i32
    %c0_i32_0 = arith.constant 0 : i32
    %c0_i32_1 = arith.constant 0 : i32
    return %c0_i32, %c0_i32_0 : i32, i32
  }
  func.func @transform_4(%arg0: i32) -> (i32, i32) {
    %c0_i32 = arith.constant 0 : i32
    %c0_i32_0 = arith.constant 0 : i32
    %c0_i32_1 = arith.constant 0 : i32
    return %c0_i32, %c0_i32_0 : i32, i32
  }
  func.func @transform_5(%arg0: i32) -> (i32, i32) {
    %c0_i32 = arith.constant 0 : i32
    %c0_i32_0 = arith.constant 0 : i32
    %c0_i32_1 = arith.constant 0 : i32
    return %c0_i32, %c0_i32_0 : i32, i32
  }
  func.func @transform_6(%arg0: i32) -> (i32, i32) {
    %c0_i32 = arith.constant 0 : i32
    %c0_i32_0 = arith.constant 0 : i32
    %c0_i32_1 = arith.constant 0 : i32
    return %c0_i32, %c0_i32_0 : i32, i32
  }
  func.func @transform_7(%arg0: i32) -> (i32, i32) {
    %c0_i32 = arith.constant 0 : i32
    %c0_i32_0 = arith.constant 0 : i32
    %c0_i32_1 = arith.constant 0 : i32
    return %c0_i32, %c0_i32_0 : i32, i32
  }
  func.func @transform_8(%arg0: i32) -> (i32, i32) {
    %c0_i32 = arith.constant 0 : i32
    %c0_i32_0 = arith.constant 0 : i32
    %c0_i32_1 = arith.constant 0 : i32
    return %c0_i32, %c0_i32_0 : i32, i32
  }
  func.func @transform_9(%arg0: i32) -> (i32, i32) {
    %c0_i32 = arith.constant 0 : i32
    %c0_i32_0 = arith.constant 0 : i32
    %c0_i32_1 = arith.constant 0 : i32
    return %c0_i32, %c0_i32_0 : i32, i32
  }
  func.func @transform_10(%arg0: i32) -> (i32, i32) {
    %c0_i32 = arith.constant 0 : i32
    %c0_i32_0 = arith.constant 0 : i32
    %c0_i32_1 = arith.constant 0 : i32
    return %c0_i32, %c0_i32_0 : i32, i32
  }
  func.func @transform_11(%arg0: i32) -> (i32, i32) {
    %c0_i32 = arith.constant 0 : i32
    %c0_i32_0 = arith.constant 0 : i32
    %c0_i32_1 = arith.constant 0 : i32
    return %c0_i32, %c0_i32_0 : i32, i32
  }
  func.func @transform_12(%arg0: i32) -> (i32, i32) {
    %c0_i32 = arith.constant 0 : i32
    %c0_i32_0 = arith.constant 0 : i32
    %c0_i32_1 = arith.constant 0 : i32
    return %c0_i32, %c0_i32_0 : i32, i32
  }
  func.func @transform_13(%arg0: i32) -> (i32, i32) {
    %c0_i32 = arith.constant 0 : i32
    %c0_i32_0 = arith.constant 0 : i32
    %c0_i32_1 = arith.constant 0 : i32
    return %c0_i32, %c0_i32_0 : i32, i32
  }
  func.func @transform_14(%arg0: i32) -> (i32, i32) {
    %c0_i32 = arith.constant 0 : i32
    %c0_i32_0 = arith.constant 0 : i32
    %c0_i32_1 = arith.constant 0 : i32
    return %c0_i32, %c0_i32_0 : i32, i32
  }
  func.func @transform_15(%arg0: i32) -> (i32, i32) {
    %c0_i32 = arith.constant 0 : i32
    %c0_i32_0 = arith.constant 0 : i32
    %c0_i32_1 = arith.constant 0 : i32
    return %c0_i32, %c0_i32_0 : i32, i32
  }
  func.func @transform_16(%arg0: i32) -> (i32, i32) {
    %c0_i32 = arith.constant 0 : i32
    %c0_i32_0 = arith.constant 0 : i32
    %c0_i32_1 = arith.constant 0 : i32
    return %c0_i32, %c0_i32_0 : i32, i32
  }
}

</mosaic_0001>

<bundles_post_ra>
// kernel: tpu_custom_call.1
= control target key start
LH: loop header
LB: loop body
LE: loop exit
PB: predicated region body
PF: predicated region fallthrough
CT: control target
= control target key end

     0   :  { %s1456_s0 = inlined_call_operand.vmem [shape: f32[16,128], index: 0, kind: input, shape index: {}]   ;;  %s1457_s1 = inlined_call_operand.vmem [shape: f32[128,96], index: 1, kind: input, shape index: {}]   ;;  %s1458_s2 = inlined_call_operand.vmem [shape: f32[1,96], index: 2, kind: input, shape index: {}]   ;;  %s1459_s3 = inlined_call_operand.vmem [shape: f32[128,32], index: 3, kind: input, shape index: {}]   ;;  %s1460_s4 = inlined_call_operand.vmem [shape: f32[16,128], index: 4, kind: input, shape index: {}]   ;;  %s1461_s5 = inlined_call_operand.vmem [shape: f32[1,128], index: 5, kind: input, shape index: {}]   ;;  %s1462_s6 = inlined_call_operand.vmem [shape: f32[32,128], index: 6, kind: input, shape index: {}]   ;;  %s1463_s7 = inlined_call_operand.vmem [shape: f32[1,128], index: 7, kind: input, shape index: {}]   ;;  %s1464_s8 = inlined_call_operand.vmem [shape: f32[1,128], index: 8, kind: input, shape index: {}]   ;;  %s1465_s9 = inlined_call_operand.vmem [shape: f32[1,128], index: 9, kind: input, shape index: {}]   ;;  %s1466_s10 = inlined_call_operand.vmem [shape: f32[128,128], index: 10, kind: input, shape index: {}]   ;;  %s1467_s11 = inlined_call_operand.vmem [shape: f32[1,128], index: 11, kind: input, shape index: {}]   ;;  %s1468_s12 = inlined_call_operand.vmem [shape: f32[128,128], index: 12, kind: input, shape index: {}]   ;;  %s1469_s13 = inlined_call_operand.vmem [shape: f32[1,128], index: 13, kind: input, shape index: {}]   ;;  %s1470_s14 = inlined_call_operand.vmem [shape: f32[1,128], index: 14, kind: input, shape index: {}]   ;;  %s1471_s15 = inlined_call_operand.vmem [shape: f32[1,128], index: 15, kind: input, shape index: {}]   ;;  %s1472_s16 = inlined_call_operand.hbm [shape: f32[16,128], index: 16, kind: output, shape index: {}]  }
   0x1   :  { %1474 = sst [smem:[#allocation5_spill]] %s1456_s0 }
   0x2   :  { %v72_v0 = vld [vmem:[%s1457_s1 + $0x78] sm:$0xff]  ;;  %v71_v1 = vld [vmem:[%s1457_s1 + $0x70] sm:$0xff]  ;;  %v70_v2 = vld [vmem:[%s1457_s1 + $0x68] sm:$0xff]  ;;  %s901_s29 = smov 32  }
   0x3   :  { %77 = vmatpush.msra.mxu0 %v72_v0  ;;  %v1004_v3 = vld [vmem:[%s1459_s3 + $0x78] sm:$0xff]  ;;  %v69_v4 = vld [vmem:[%s1457_s1 + $0x60] sm:$0xff]  ;;  %v1015_v5 = vld [vmem:[%s1459_s3 + $0x70] sm:$0xff] }
   0x4   :  { %162 = vrot.lane.b32.xlu0 %v1004_v3, %s901_s29  ;;  %384 = vmatpush.msra.mxu2 %v1004_v3  ;;  %v1020_v6 = vld [vmem:[%s1459_s3 + $0x68] sm:$0xff]  ;;  %v68_v7 = vld [vmem:[%s1457_s1 + $0x58] sm:$0xff]  ;;  %v67_v8 = vld [vmem:[%s1457_s1 + $0x50] sm:$0xff] }
   0x5   :  { %78 = vmatpush.msra.mxu0 %v71_v1  ;;  %158 = vrot.lane.b32.xlu1 %v1020_v6, %s901_s29  ;;  %v66_v9 = vld [vmem:[%s1457_s1 + $0x48] sm:$0xff]  ;;  %v1038_v10 = vld [vmem:[%s1459_s3 + $0x60] sm:$0xff]  ;;  %v1043_v11 = vld [vmem:[%s1459_s3 + $0x58] sm:$0xff] }
   0x6   :  { %385 = vmatpush.msra.mxu2 %v1015_v5  ;;  %v65_v12 = vld [vmem:[%s1457_s1 + $0x40] sm:$0xff]  ;;  %154 = vrot.lane.b32.xlu2 %v1043_v11, %s901_s29 }
   0x7   :  { %79 = vmatpush.msra.mxu0 %v70_v2 }
   0x8   :  { %386 = vmatpush.msra.mxu2 %v1020_v6 }
   0x9   :  { %80 = vmatpush.msra.mxu0 %v69_v4 }
   0xa   :  { %387 = vmatpush.msra.mxu2 %v1038_v10 }
   0xb   :  { %81 = vmatpush.msra.mxu0 %v68_v7 }
   0xc   :  { %160 = vrot.lane.b32.xlu0 %v1015_v5, %s901_s29  ;;  %388 = vmatpush.msra.mxu2 %v1043_v11 }
   0xd   :  { %82 = vmatpush.msra.mxu0 %v67_v8 }
   0xe   :  { %21 = vsyncpa [#allocation3], 0  ;;  %v1057_v13 = vld [vmem:[%s1459_s3 + $0x50] sm:$0xff]  ;;  %v64_v14 = vld [vmem:[%s1457_s1 + $0x38] sm:$0xff]  ;;  %156 = vrot.lane.b32.xlu1 %v1038_v10, %s901_s29  ;;  %s1475_s23 = sld [smem:[#allocation5_spill]]  ;;  %s902_s21 = smov 96  }
   0xf   :  { %83 = vmatpush.msra.mxu0 %v66_v9  ;;  %389 = vmatpush.msra.mxu2 %v1057_v13  ;;  %v1068_v15 = vld [vmem:[%s1459_s3 + $0x48] sm:$0xff]  ;;  %v63_v16 = vld [vmem:[%s1457_s1 + $0x30] sm:$0xff]  ;;  %v1077_v17 = vld [vmem:[%s1459_s3 + $0x40] sm:$0xff]  ;;  %vm308_vm0 = vcmask 261120  }
  0x10   :  { %v62_v18 = vld [vmem:[%s1457_s1 + $0x28] sm:$0xff]  ;;  %152 = vrot.lane.b32.xlu2 %v1057_v13, %s901_s29  ;;  %v1090_v19 = vld [vmem:[%s1459_s3 + $0x38] sm:$0xff]  ;;  %v61_v20 = vld [vmem:[%s1457_s1 + $0x20] sm:$0xff] }
  0x11   :  { %84 = vmatpush.msra.mxu0 %v65_v12  ;;  %390 = vmatpush.msra.mxu2 %v1068_v15  ;;  %v1099_v21 = vld [vmem:[%s1459_s3 + $0x30] sm:$0xff]  ;;  %v60_v22 = vld [vmem:[%s1457_s1 + $0x18] sm:$0xff]  ;;  %v1110_v23 = vld [vmem:[%s1459_s3 + $0x28] sm:$0xff] }
  0x12   :  { %v59_v24 = vld [vmem:[%s1457_s1 + $0x10] sm:$0xff]  ;;  %v1119_v25 = vld [vmem:[%s1459_s3 + $0x20] sm:$0xff]  ;;  %v58_v26 = vld [vmem:[%s1457_s1 + $0x8] sm:$0xff] }
  0x13   :  { %85 = vmatpush.msra.mxu0 %v64_v14  ;;  %391 = vmatpush.msra.mxu2 %v1077_v17  ;;  %v57_v27 = vld [vmem:[%s1457_s1] sm:$0xff]  ;;  %v1151_v30 = vld [vmem:[%s1459_s3 + $0x18] sm:$0xff]  ;;  %v1157_v31 = vld [vmem:[%s1459_s3 + $0x10] sm:$0xff] }
  0x14   :  { %150 = vrot.lane.b32.xlu0 %v1068_v15, %s901_s29  ;;  %v1135_v28 = vld [vmem:[%s1475_s23] sm:$0xff]  ;;  %v1145_v29 = vld [vmem:[%s1475_s23 + $0x8] sm:$0xff] }
  0x15   :  { %86 = vmatpush.msra.mxu0 %v63_v16  ;;  %392 = vmatpush.msra.mxu2 %v1090_v19  ;;  %v1163_v32 = vld [vmem:[%s1459_s3 + $0x8] sm:$0xff]  ;;  %v850_v34 = vld [vmem:[%s1458_s2] ss:$0 sm:$0xff]  ;;  %s903_s2 = smov 64  }
  0x16   :  { %148 = vrot.lane.b32.xlu1 %v1077_v17, %s901_s29  ;;  %v1172_v35 = vld [vmem:[%s1459_s3] sm:$0xff]  ;;  %s772_s3 = sshll.u32 %s1472_s16, 4  ;;  %s773_s3 = int_to_ptr.hbm [resolvable:$true] %s772_s3 }
  0x17   :  { %87 = vmatpush.msra.mxu0 %v62_v18  ;;  %393 = vmatpush.msra.mxu2 %v1099_v21 }
  0x18   :  { %146 = vrot.lane.b32.xlu2 %v1090_v19, %s901_s29 }
  0x19   :  { %88 = vmatpush.msra.mxu0 %v61_v20  ;;  %394 = vmatpush.msra.mxu2 %v1110_v23 }
  0x1b   :  { %89 = vmatpush.msra.mxu0 %v60_v22  ;;  %395 = vmatpush.msra.mxu2 %v1119_v25 }
  0x1c   :  { %144 = vrot.lane.b32.xlu0 %v1099_v21, %s901_s29 }
  0x1d   :  { %90 = vmatpush.msra.mxu0 %v59_v24  ;;  %396 = vmatpush.msra.mxu2 %v1151_v30 }
  0x1e   :  { %142 = vrot.lane.b32.xlu1 %v1110_v23, %s901_s29 }
  0x1f   :  { %91 = vmatpush.msra.mxu0 %v58_v26  ;;  %397 = vmatpush.msra.mxu2 %v1157_v31 }
  0x21   :  { %92 = vmatpush.msra.mxu0 %v57_v27  ;;  %398 = vmatpush.msra.mxu2 %v1163_v32 }
  0x22   :  { %93 = vmatmul.f32.vlgmr.msra.gmra.mxu0 %v1135_v28 }
  0x23   :  { %399 = vmatpush.msra.mxu2 %v1172_v35 }
  0x24   :  { %140 = vrot.lane.b32.xlu0 %v1119_v25, %s901_s29 }
  0x2a   :  { %96 = vmatmul.f32.gmra.mxu0 %v1145_v29 }
  0x60   :  { %v155_v45 = vpop.permute.xlu2 %154 }
  0x6a   :  { %v153_v48 = vpop.permute.xlu2 %152 }
  0x72   :  { %v147_v54 = vpop.permute.xlu2 %146 }
  0x76   :  { %v163_v33 = vpop.permute.xlu0 %162 }
  0x77   :  { %v159_v42 = vpop.permute.xlu1 %158 }
  0x7e   :  { %v161_v38 = vpop.permute.xlu0 %160 }
  0x80   :  { %v157_v49 = vpop.permute.xlu1 %156 }
  0x86   :  { %v151_v46 = vpop.permute.xlu0 %150 }
  0x88   :  { %v149_v57 = vpop.permute.xlu1 %148 }
  0x8e   :  { %v145_v53 = vpop.permute.xlu0 %144 }
  0x90   :  { %v143_v61 = vpop.permute.xlu1 %142 }
  0x96   :  { %v141_v58 = vpop.permute.xlu0 %140 }
  0x9f   :  { %v94_v36 = vpop.f32.mrf.mxu0 }
  0xa0   :  { %v1175_v37 = vadd.f32 %v850_v34, %v94_v36 }
  0xa2   :  { %v194_v39 = vmul.f32 %v161_v38, %v1175_v37  ;;  %v190_v50 = vmul.f32 %v153_v48, %v1175_v37  ;;  %v192_v51 = vmul.f32 %v157_v49, %v1175_v37  ;;  %v186_v56 = vmul.f32 %v145_v53, %v1175_v37 }
  0xa3   :  { %v188_v59 = vmul.f32 %v149_v57, %v1175_v37  ;;  %v184_v60 = vmul.f32 %v141_v58, %v1175_v37 }
  0xa4   :  { %304 = vrot.lane.b32.xlu1 %v194_v39, %s902_s21 }
  0xa7   :  { %v97_v40 = vpop.f32.mrf.mxu0 }
  0xa8   :  { %v1179_v41 = vadd.f32 %v850_v34, %v97_v40 }
  0xaa   :  { %v195_v43 = vmul.f32 %v163_v33, %v1179_v41  ;;  %v193_v44 = vmul.f32 %v159_v42, %v1179_v41  ;;  %v191_v47 = vmul.f32 %v155_v45, %v1179_v41  ;;  %v189_v52 = vmul.f32 %v151_v46, %v1179_v41 }
  0xab   :  { %v187_v55 = vmul.f32 %v147_v54, %v1179_v41  ;;  %v185_v62 = vmul.f32 %v143_v61, %v1179_v41 }
  0xac   :  { %306 = vrot.lane.b32.xlu2 %v195_v43, %s902_s21  ;;  %302 = vrot.lane.b32.xlu0 %v193_v44, %s902_s21 }
  0xad   :  { %136 = vrot.lane.b32.xlu1 %v1157_v31, %s901_s29 }
  0xb4   :  { %138 = vrot.lane.b32.xlu2 %v1151_v30, %s901_s29  ;;  %134 = vrot.lane.b32.xlu0 %v1163_v32, %s901_s29 }
  0xb5   :  { %298 = vrot.lane.b32.xlu1 %v191_v47, %s902_s21 }
  0xbc   :  { %300 = vrot.lane.b32.xlu2 %v192_v51, %s902_s21  ;;  %296 = vrot.lane.b32.xlu0 %v190_v50, %s902_s21 }
  0xbd   :  { %294 = vrot.lane.b32.xlu1 %v189_v52, %s902_s21 }
  0xc4   :  { %132 = vrot.lane.b32.xlu2 %v1172_v35, %s901_s29  ;;  %290 = vrot.lane.b32.xlu0 %v187_v55, %s902_s21  ;;  %s906_s29 = smov 8  }
  0xc5   :  { %288 = vrot.lane.b32.xlu1 %v186_v56, %s902_s21 }
  0xcc   :  { %292 = vrot.lane.b32.xlu2 %v188_v59, %s902_s21  ;;  %284 = vrot.lane.b32.xlu0 %v184_v60, %s902_s21 }
  0xd4   :  { %286 = vrot.lane.b32.xlu2 %v185_v62, %s902_s21 }
 0x106   :  { %v307_v63 = vpop.permute.xlu2 %306 }
 0x107   :  { %784 = vmatpush.xpose.msk.msra.mxu1 %vm308_vm0, %v307_v63 }
 0x10e   :  { %v139_v0 = vpop.permute.xlu2 %138 }
 0x10f   :  { %v183_v1 = vmul.f32 %v139_v0, %v1179_v41 }
 0x111   :  { %282 = vrot.lane.b32.xlu1 %v183_v1, %s902_s21 }
 0x116   :  { %v305_v2 = vpop.permute.xlu1 %304  ;;  %v301_v4 = vpop.permute.xlu2 %300 }
 0x117   :  { %785 = vmatpush.xpose.msk.msra.mxu1 %vm308_vm0, %v305_v2 }
 0x11e   :  { %v303_v7 = vpop.permute.xlu0 %302  ;;  %v133_v8 = vpop.permute.xlu2 %132 }
 0x11f   :  { %v137_v9 = vpop.permute.xlu1 %136  ;;  %v180_v12 = vmul.f32 %v133_v8, %v1175_v37  ;;  %786 = vmatpush.xpose.msk.msra.mxu1 %vm308_vm0, %v303_v7 }
 0x120   :  { %v182_v14 = vmul.f32 %v137_v9, %v1175_v37 }
 0x121   :  { %276 = vrot.lane.b32.xlu1 %v180_v12, %s902_s21 }
 0x122   :  { %280 = vrot.lane.b32.xlu2 %v182_v14, %s902_s21 }
 0x123   :  { %787 = vmatpush.xpose.msk.msra.mxu1 %vm308_vm0, %v301_v4 }
 0x126   :  { %v135_v16 = vpop.permute.xlu0 %134 }
 0x127   :  { %v181_v18 = vmul.f32 %v135_v16, %v1179_v41  ;;  %v299_v20 = vpop.permute.xlu1 %298 }
 0x128   :  { %788 = vmatpush.xpose.msk.msra.mxu1 %vm308_vm0, %v299_v20 }
 0x129   :  { %222 = vrot.lane.b32.xlu1 %v1020_v6, %s903_s2  ;;  %278 = vrot.lane.b32.xlu0 %v181_v18, %s902_s21  ;;  %v293_v6 = vpop.permute.xlu2 %292 }
 0x12a   :  { %226 = vrot.lane.b32.xlu2 %v1004_v3, %s903_s2 }
 0x12e   :  { %v297_v22 = vpop.permute.xlu0 %296 }
 0x12f   :  { %789 = vmatpush.xpose.msk.msra.mxu1 %vm308_vm0, %v297_v22  ;;  %v295_v24 = vpop.permute.xlu1 %294 }
 0x131   :  { %216 = vrot.lane.b32.xlu1 %v1057_v13, %s903_s2  ;;  %224 = vrot.lane.b32.xlu0 %v1015_v5, %s903_s2 }
 0x132   :  { %220 = vrot.lane.b32.xlu2 %v1038_v10, %s903_s2  ;;  %v287_v10 = vpop.permute.xlu2 %286 }
 0x133   :  { %790 = vmatpush.xpose.msk.msra.mxu1 %vm308_vm0, %v295_v24 }
 0x136   :  { %v291_v3 = vpop.permute.xlu0 %290 }
 0x137   :  { %791 = vmatpush.xpose.msk.msra.mxu1 %vm308_vm0, %v293_v6  ;;  %v289_v5 = vpop.permute.xlu1 %288 }
 0x139   :  { %210 = vrot.lane.b32.xlu1 %v1090_v19, %s903_s2  ;;  %218 = vrot.lane.b32.xlu0 %v1043_v11, %s903_s2 }
 0x13a   :  { %214 = vrot.lane.b32.xlu2 %v1068_v15, %s903_s2 }
 0x13b   :  { %792 = vmatpush.xpose.msk.msra.mxu1 %vm308_vm0, %v291_v3 }
 0x13e   :  { %v285_v11 = vpop.permute.xlu0 %284 }
 0x13f   :  { %793 = vmatpush.xpose.msk.msra.mxu1 %vm308_vm0, %v289_v5 }
 0x141   :  { %204 = vrot.lane.b32.xlu1 %v1119_v25, %s903_s2  ;;  %212 = vrot.lane.b32.xlu0 %v1077_v17, %s903_s2 }
 0x142   :  { %208 = vrot.lane.b32.xlu2 %v1099_v21, %s903_s2 }
 0x143   :  { %794 = vmatpush.xpose.msk.msra.mxu1 %vm308_vm0, %v287_v10 }
 0x147   :  { %795 = vmatpush.xpose.msk.msra.mxu1 %vm308_vm0, %v285_v11 }
 0x149   :  { %198 = vrot.lane.b32.xlu1 %v1163_v32, %s903_s2  ;;  %206 = vrot.lane.b32.xlu0 %v1110_v23, %s903_s2 }
 0x14a   :  { %202 = vrot.lane.b32.xlu2 %v1151_v30, %s903_s2 }
 0x151   :  { %200 = vrot.lane.b32.xlu0 %v1157_v31, %s903_s2 }
 0x152   :  { %196 = vrot.lane.b32.xlu2 %v1172_v35, %s903_s2 }
 0x17c   :  { %v281_v15 = vpop.permute.xlu2 %280 }
 0x183   :  { %v283_v13 = vpop.permute.xlu1 %282 }
 0x184   :  { %796 = vmatpush.xpose.msk.msra.mxu1 %vm308_vm0, %v283_v13  ;;  %v227_v17 = vpop.permute.xlu2 %226 }
 0x185   :  { %v259_v32 = vmul.f32 %v227_v17, %v1179_v41 }
 0x188   :  { %797 = vmatpush.xpose.msk.msra.mxu1 %vm308_vm0, %v281_v15 }
 0x18c   :  { %v221_v21 = vpop.permute.xlu2 %220 }
 0x18d   :  { %v256_v26 = vmul.f32 %v221_v21, %v1175_v37 }
 0x193   :  { %v277_v19 = vpop.permute.xlu1 %276 }
 0x194   :  { %v215_v42 = vpop.permute.xlu2 %214 }
 0x195   :  { %v253_v44 = vmul.f32 %v215_v42, %v1179_v41 }
 0x19b   :  { %v223_v25 = vpop.permute.xlu1 %222  ;;  %v279_v23 = vpop.permute.xlu0 %278 }
 0x19c   :  { %v257_v27 = vmul.f32 %v223_v25, %v1179_v41  ;;  %798 = vmatpush.xpose.msk.msra.mxu1 %vm308_vm0, %v279_v23  ;;  %v209_v48 = vpop.permute.xlu2 %208 }
 0x19d   :  { %v250_v50 = vmul.f32 %v209_v48, %v1175_v37 }
 0x19e   :  { %v815_v30 = vpack.i.bf16 %v256_v26, %v257_v27 }
 0x1a0   :  { %816 = vrot.lane.b32.xlu2 %v815_v30, %s903_s2  ;;  %799 = vmatpush.xpose.msk.msra.mxu1 %vm308_vm0, %v277_v19 }
 0x1a3   :  { %800 = vmatmul.msk.f32.vlgmr.msra.gmra.mxu1 %vm308_vm0, %v1175_v37  ;;  %v225_v31 = vpop.permute.xlu0 %224  ;;  %v217_v35 = vpop.permute.xlu1 %216 }
 0x1a4   :  { %v258_v33 = vmul.f32 %v225_v31, %v1175_v37  ;;  %v254_v38 = vmul.f32 %v217_v35, %v1175_v37  ;;  %v203_v58 = vpop.permute.xlu2 %202  ;;  %v381_v35 = vld [vmem:[%s1460_s4 + $0x8] sm:$0xff] }
 0x1a5   :  { %v247_v60 = vmul.f32 %v203_v58, %v1179_v41 }
 0x1a6   :  { %v810_v34 = vpack.i.bf16 %v258_v33, %v259_v32 }
 0x1a8   :  { %811 = vrot.lane.b32.xlu1 %v810_v34, %s903_s2 }
 0x1ab   :  { %801 = vmatmul.msk.f32.gmra.mxu1 %vm308_vm0, %v1179_v41  ;;  %v219_v36 = vpop.permute.xlu0 %218  ;;  %v211_v47 = vpop.permute.xlu1 %210 }
 0x1ac   :  { %v255_v39 = vmul.f32 %v219_v36, %v1179_v41  ;;  %v251_v49 = vmul.f32 %v211_v47, %v1179_v41  ;;  %v197_v62 = vpop.permute.xlu2 %196 }
 0x1ad   :  { %v244_v17 = vmul.f32 %v197_v62, %v1175_v37 }
 0x1ae   :  { %v820_v40 = vpack.i.bf16 %v254_v38, %v255_v39  ;;  %v830_v52 = vpack.i.bf16 %v250_v50, %v251_v49 }
 0x1b0   :  { %821 = vrot.lane.b32.xlu2 %v820_v40, %s903_s2 }
 0x1b3   :  { %v213_v43 = vpop.permute.xlu0 %212  ;;  %v205_v53 = vpop.permute.xlu1 %204 }
 0x1b4   :  { %v252_v45 = vmul.f32 %v213_v43, %v1175_v37  ;;  %v248_v55 = vmul.f32 %v205_v53, %v1175_v37  ;;  %v527_v43 = vld [vmem:[%s1462_s6 + $0x18] sm:$0xff] }
 0x1b5   :  { %550 = vmatpush.msrb.mxu0 %v527_v43 }
 0x1b6   :  { %v825_v46 = vpack.i.bf16 %v252_v45, %v253_v44  ;;  %v526_v44 = vld [vmem:[%s1462_s6 + $0x10] sm:$0xff]  ;;  %v525_v45 = vld [vmem:[%s1462_s6 + $0x8] sm:$0xff] }
 0x1b7   :  { %551 = vmatpush.msrb.mxu0 %v526_v44 }
 0x1b8   :  { %826 = vrot.lane.b32.xlu2 %v825_v46, %s903_s2  ;;  %v524_v46 = vld [vmem:[%s1462_s6] sm:$0xff] }
 0x1b9   :  { %552 = vmatpush.msrb.mxu0 %v525_v45 }
 0x1bb   :  { %v207_v51 = vpop.permute.xlu0 %206  ;;  %v199_v1 = vpop.permute.xlu1 %198  ;;  %553 = vmatpush.msrb.mxu0 %v524_v46  ;;  %v680_v46 = vld [vmem:[%s1468_s12 + $0x78] sm:$0xff] }
 0x1bc   :  { %v249_v54 = vmul.f32 %v207_v51, %v1179_v41  ;;  %v245_v11 = vmul.f32 %v199_v1, %v1179_v41 }
 0x1be   :  { %v835_v56 = vpack.i.bf16 %v248_v55, %v249_v54  ;;  %v845_v21 = vpack.i.bf16 %v244_v17, %v245_v11 }
 0x1c0   :  { %831 = vrot.lane.b32.xlu2 %v830_v52, %s903_s2 }
 0x1c3   :  { %v201_v57 = vpop.permute.xlu0 %200 }
 0x1c4   :  { %v246_v59 = vmul.f32 %v201_v57, %v1175_v37  ;;  %v380_v37 = vld [vmem:[%s1460_s4] sm:$0xff] }
 0x1c6   :  { %v840_v61 = vpack.i.bf16 %v246_v59, %v247_v60 }
 0x1c8   :  { %836 = vrot.lane.b32.xlu2 %v835_v56, %s903_s2 }
 0x1d0   :  { %841 = vrot.lane.b32.xlu2 %v840_v61, %s903_s2 }
 0x1fa   :  { %v817_v63 = vpop.permute.xlu2 %816 }
 0x1fb   :  { %v818_v12 = vunpack.i.l.bf16 %v817_v63  ;;  %v819_v16 = vunpack.i.h.bf16 %v817_v63 }
 0x20a   :  { %v822_v0 = vpop.permute.xlu2 %821 }
 0x20b   :  { %v823_v18 = vunpack.i.l.bf16 %v822_v0  ;;  %v824_v20 = vunpack.i.h.bf16 %v822_v0 }
 0x212   :  { %v827_v2 = vpop.permute.xlu2 %826 }
 0x213   :  { %v828_v24 = vunpack.i.l.bf16 %v827_v2  ;;  %v829_v3 = vunpack.i.h.bf16 %v827_v2 }
 0x21a   :  { %v812_v4 = vpop.permute.xlu1 %811  ;;  %v832_v8 = vpop.permute.xlu2 %831 }
 0x21b   :  { %v813_v7 = vunpack.i.l.bf16 %v812_v4  ;;  %v814_v9 = vunpack.i.h.bf16 %v812_v4  ;;  %v833_v5 = vunpack.i.l.bf16 %v832_v8  ;;  %v834_v10 = vunpack.i.h.bf16 %v832_v8 }
 0x21d   :  { %471 = vmatpush.msra.mxu3 %v813_v7 }
 0x21f   :  { %472 = vmatpush.msra.mxu3 %v814_v9 }
 0x220   :  { %v364_v14 = vpop.f32.mrf.mxu1 }
 0x221   :  { %370 = vmax.xlane.f32.xlu0 %v364_v14  ;;  %473 = vmatpush.msra.mxu3 %v818_v12 }
 0x222   :  { %v837_v22 = vpop.permute.xlu2 %836 }
 0x223   :  { %474 = vmatpush.msra.mxu3 %v819_v16  ;;  %v838_v13 = vunpack.i.l.bf16 %v837_v22  ;;  %v839_v19 = vunpack.i.h.bf16 %v837_v22  ;;  %v851_v16 = vld [vmem:[%s1463_s7] ss:$0 sm:$0xff] }
 0x225   :  { %475 = vmatpush.msra.mxu3 %v823_v18 }
 0x227   :  { %476 = vmatpush.msra.mxu3 %v824_v20 }
 0x228   :  { %v367_v6 = vpop.f32.mrf.mxu1 }
 0x229   :  { %372 = vmax.xlane.f32.xlu1 %v367_v6  ;;  %477 = vmatpush.msra.mxu3 %v828_v24 }
 0x22a   :  { %v842_v15 = vpop.permute.xlu2 %841 }
 0x22b   :  { %478 = vmatpush.msra.mxu3 %v829_v3  ;;  %v843_v25 = vunpack.i.l.bf16 %v842_v15  ;;  %v844_v23 = vunpack.i.h.bf16 %v842_v15 }
 0x22d   :  { %479 = vmatpush.msra.mxu3 %v833_v5  ;;  %v635_v5 = vld [vmem:[%s1466_s10 + $0x78] sm:$0xff] }
 0x22e   :  { %640 = vmatpush.msrb.mxu2 %v635_v5 }
 0x22f   :  { %480 = vmatpush.msra.mxu3 %v834_v10  ;;  %v634_v10 = vld [vmem:[%s1466_s10 + $0x70] sm:$0xff] }
 0x230   :  { %641 = vmatpush.msrb.mxu2 %v634_v10 }
 0x231   :  { %481 = vmatpush.msra.mxu3 %v838_v13 }
 0x233   :  { %482 = vmatpush.msra.mxu3 %v839_v19 }
 0x235   :  { %846 = vrot.lane.b32.xlu0 %v845_v21, %s903_s2  ;;  %483 = vmatpush.msra.mxu3 %v843_v25 }
 0x237   :  { %484 = vmatpush.msra.mxu3 %v844_v23 }
 0x294   :  { %v371_v26 = vpop.xlane.xlu0 %370 }
 0x295   :  { %v374_v27 = vsub.f32 %v364_v14, %v371_v26 }
 0x297   :  { %v376_v30 = vmul.f32 1.442695, %v374_v27  ;;  %v633_v27 = vld [vmem:[%s1466_s10 + $0x68] sm:$0xff] }
 0x298   :  { %642 = vmatpush.msrb.mxu2 %v633_v27 }
 0x299   :  { %859 = vpow2.f32 %v376_v30  ;;  %v632_v30 = vld [vmem:[%s1466_s10 + $0x60] sm:$0xff] }
 0x29a   :  { %643 = vmatpush.msrb.mxu2 %v632_v30 }
 0x29c   :  { %v373_v41 = vpop.xlane.xlu1 %372 }
 0x29d   :  { %v375_v31 = vsub.f32 %v367_v6, %v373_v41  ;;  %v631_v41 = vld [vmem:[%s1466_s10 + $0x58] sm:$0xff] }
 0x29e   :  { %644 = vmatpush.msrb.mxu2 %v631_v41  ;;  %v856_v41 = vld [vmem:[%s1469_s13] ss:$0 sm:$0xff] }
 0x29f   :  { %v860_v32 = vpop.eup %859  ;;  %v378_v33 = vmul.f32 1.442695, %v375_v31  ;;  %v630_v31 = vld [vmem:[%s1466_s10 + $0x50] sm:$0xff] }
 0x2a0   :  { %v382_v34 = vmul.f32 %v860_v32, %v380_v37  ;;  %645 = vmatpush.msrb.mxu2 %v630_v31  ;;  %v629_v37 = vld [vmem:[%s1466_s10 + $0x48] sm:$0xff]  ;;  %v628_v32 = vld [vmem:[%s1466_s10 + $0x40] sm:$0xff] }
 0x2a1   :  { %861 = vpow2.f32 %v378_v33  ;;  %v627_v33 = vld [vmem:[%s1466_s10 + $0x38] sm:$0xff] }
 0x2a2   :  { %400 = vmatmul.f32.vlgmr.msra.gmra.mxu2 %v382_v34 }
 0x2a3   :  { %646 = vmatpush.msrb.mxu2 %v629_v37 }
 0x2a5   :  { %647 = vmatpush.msrb.mxu2 %v628_v32 }
 0x2a7   :  { %v862_v36 = vpop.eup %861  ;;  %v847_v38 = vpop.permute.xlu0 %846  ;;  %648 = vmatpush.msrb.mxu2 %v627_v33 }
 0x2a8   :  { %v383_v39 = vmul.f32 %v862_v36, %v381_v35  ;;  %v848_v40 = vunpack.i.l.bf16 %v847_v38  ;;  %v849_v42 = vunpack.i.h.bf16 %v847_v38  ;;  %v625_v35 = vld [vmem:[%s1466_s10 + $0x28] sm:$0xff]  ;;  %v624_v36 = vld [vmem:[%s1466_s10 + $0x20] sm:$0xff]  ;;  %v623_v38 = vld [vmem:[%s1466_s10 + $0x18] sm:$0xff] }
 0x2aa   :  { %403 = vmatmul.f32.gmra.mxu2 %v383_v39  ;;  %485 = vmatpush.msra.mxu3 %v848_v40  ;;  %v621_v40 = vld [vmem:[%s1466_s10 + $0x8] sm:$0xff] }
 0x2ac   :  { %486 = vmatpush.msra.mxu3 %v849_v42  ;;  %v620_v42 = vld [vmem:[%s1466_s10] sm:$0xff] }
 0x2ad   :  { %487 = vmatmul.f32.vlgmr.msra.gmra.mxu3 %v382_v34  ;;  %v626_v34 = vld [vmem:[%s1466_s10 + $0x30] sm:$0xff] }
 0x2ae   :  { %649 = vmatpush.msrb.mxu2 %v626_v34  ;;  %685 = vmatpush.msrb.mxu3 %v680_v46 }
 0x2b0   :  { %650 = vmatpush.msrb.mxu2 %v625_v35 }
 0x2b2   :  { %651 = vmatpush.msrb.mxu2 %v624_v36 }
 0x2b4   :  { %652 = vmatpush.msrb.mxu2 %v623_v38 }
 0x2b5   :  { %490 = vmatmul.f32.gmra.mxu3 %v383_v39  ;;  %v622_v39 = vld [vmem:[%s1466_s10 + $0x10] sm:$0xff] }
 0x2b6   :  { %653 = vmatpush.msrb.mxu2 %v622_v39 }
 0x2b8   :  { %654 = vmatpush.msrb.mxu2 %v621_v40 }
 0x2ba   :  { %655 = vmatpush.msrb.mxu2 %v620_v42 }
 0x325   :  { %v401_v47 = vpop.f32.mrf.mxu2 }
 0x326   :  { %863 = vrcp.f32 %v401_v47  ;;  %v505_v52 = vand.u32 2147483648, %v401_v47  ;;  %v503_v54 = vand.u32 2147483647, %v401_v47  ;;  %vm499_vm2 = vweird.f32 %v401_v47 }
 0x328   :  { %v506_v58 = vor.u32 1.1754944e-38, %v505_v52  ;;  %vm504_vm4 = vcmp.eq.f32.partialorder %v503_v54, 8.507059e+37  ;;  %v676_v54 = vld [vmem:[%s1468_s12 + $0x58] sm:$0xff] }
 0x32c   :  { %v864_v48 = vpop.eup %863 }
 0x32d   :  { %v495_v49 = vmul.f32 %v864_v48, %v401_v47  ;;  %v404_v50 = vpop.f32.mrf.mxu2  ;;  %vm500_vm1 = vweird.f32 %v864_v48  ;;  %v679_v47 = vld [vmem:[%s1468_s12 + $0x70] sm:$0xff] }
 0x32e   :  { %865 = vrcp.f32 %v404_v50  ;;  %vm501_vm3 = vmor %vm499_vm2, %vm500_vm1  ;;  %v520_v0 = vand.u32 2147483648, %v404_v50  ;;  %v518_v2 = vand.u32 2147483647, %v404_v50  ;;  %vm514_vm6 = vweird.f32 %v404_v50  ;;  %686 = vmatpush.msrb.mxu3 %v679_v47 }
 0x32f   :  { %v496_v51 = vsub.f32 1.0, %v495_v49 }
 0x330   :  { %v488_v57 = vpop.f32.mrf.mxu3  ;;  %v521_v7 = vor.u32 1.1754944e-38, %v520_v0  ;;  %vm519_vm8 = vcmp.eq.f32.partialorder %v518_v2, 8.507059e+37  ;;  %v853_v2 = vld [vmem:[%s1464_s8] ss:$0 sm:$0xff] }
 0x331   :  { %v497_v53 = vmul.f32 %v864_v48, %v496_v51  ;;  %v677_v51 = vld [vmem:[%s1468_s12 + $0x60] sm:$0xff] }
 0x333   :  { %v498_v55 = vadd.f32 %v864_v48, %v497_v53 }
 0x334   :  { %v866_v56 = vpop.eup %865 }
 0x335   :  { %v510_v59 = vmul.f32 %v866_v56, %v404_v50  ;;  %v502_v60 = vsel %vm501_vm3, %v864_v48, %v498_v55  ;;  %vm515_vm5 = vweird.f32 %v866_v56  ;;  %v678_v48 = vld [vmem:[%s1468_s12 + $0x68] sm:$0xff] }
 0x336   :  { %v507_v61 = vsel %vm504_vm4, %v506_v58, %v502_v60  ;;  %vm516_vm7 = vmor %vm514_vm6, %vm515_vm5  ;;  %687 = vmatpush.msrb.mxu3 %v678_v48  ;;  %v674_v58 = vld [vmem:[%s1468_s12 + $0x48] sm:$0xff]  ;;  %v673_v60 = vld [vmem:[%s1468_s12 + $0x40] sm:$0xff] }
 0x337   :  { %v511_v62 = vsub.f32 1.0, %v510_v59  ;;  %v508_v63 = vmul.f32 %v507_v61, %v488_v57 }
 0x338   :  { %v491_v9 = vpop.f32.mrf.mxu3  ;;  %688 = vmatpush.msrb.mxu3 %v677_v51 }
 0x339   :  { %v512_v1 = vmul.f32 %v866_v56, %v511_v62  ;;  %802 = vmatmul.msk.f32.vlgmr.msrb.gmra.mxu0 %vm308_vm0, %v508_v63  ;;  %v672_v63 = vld [vmem:[%s1468_s12 + $0x38] sm:$0xff] }
 0x33a   :  { %689 = vmatpush.msrb.mxu3 %v676_v54 }
 0x33b   :  { %v513_v4 = vadd.f32 %v866_v56, %v512_v1 }
 0x33d   :  { %v517_v8 = vsel %vm516_vm7, %v866_v56, %v513_v4  ;;  %v675_v56 = vld [vmem:[%s1468_s12 + $0x50] sm:$0xff] }
 0x33e   :  { %v522_v12 = vsel %vm519_vm8, %v521_v7, %v517_v8  ;;  %690 = vmatpush.msrb.mxu3 %v675_v56  ;;  %v671_v4 = vld [vmem:[%s1468_s12 + $0x30] sm:$0xff] }
 0x33f   :  { %v523_v14 = vmul.f32 %v522_v12, %v491_v9  ;;  %v854_v12 = vld [vmem:[%s1465_s9] ss:$0 sm:$0xff] }
 0x340   :  { %691 = vmatpush.msrb.mxu3 %v674_v58 }
 0x341   :  { %803 = vmatmul.msk.f32.gmra.mxu0 %vm308_vm0, %v523_v14  ;;  %v670_v14 = vld [vmem:[%s1468_s12 + $0x28] sm:$0xff] }
 0x342   :  { %692 = vmatpush.msrb.mxu3 %v673_v60 }
 0x344   :  { %693 = vmatpush.msrb.mxu3 %v672_v63 }
 0x346   :  { %694 = vmatpush.msrb.mxu3 %v671_v4 }
 0x348   :  { %695 = vmatpush.msrb.mxu3 %v670_v14 }
 0x3b6   :  { %v555_v18 = vpop.f32.mrf.mxu0 }
 0x3b7   :  { %v556_v20 = vadd.f32 %v851_v16, %v555_v18 }
 0x3b9   :  { %v561_v22 = vadd.f32 %v556_v20, %v1135_v28  ;;  %v1329_v28 = vld [vmem:[%s1461_s5] ss:$0 sm:$0xff] }
 0x3ba   :  { %v669_v20 = vld [vmem:[%s1468_s12 + $0x20] sm:$0xff] }
 0x3bb   :  { %565 = vadd.xlane.f32.xlu2 %v561_v22  ;;  %696 = vmatpush.msrb.mxu3 %v669_v20 }
 0x3be   :  { %v558_v24 = vpop.f32.mrf.mxu0 }
 0x3bf   :  { %v559_v6 = vadd.f32 %v851_v16, %v558_v24 }
 0x3c1   :  { %v562_v3 = vadd.f32 %v559_v6, %v1145_v29  ;;  %v668_v6 = vld [vmem:[%s1468_s12 + $0x18] sm:$0xff] }
 0x3c2   :  { %697 = vmatpush.msrb.mxu3 %v668_v6 }
 0x3c3   :  { %567 = vadd.xlane.f32.xlu1 %v562_v3 }
 0x42e   :  { %v566_v11 = vpop.xlane.xlu2 %565 }
 0x42f   :  { %v569_v13 = vmul.f32 0.03125, %v566_v11 }
 0x431   :  { %v574_v29 = vmul.f32 %v1329_v28, %v569_v13 }
 0x433   :  { %v1332_v15 = vsub.f32 %v561_v22, %v574_v29  ;;  %v667_v29 = vld [vmem:[%s1468_s12 + $0x10] sm:$0xff] }
 0x434   :  { %698 = vmatpush.msrb.mxu3 %v667_v29 }
 0x435   :  { %v578_v17 = vmul.f32 %v1332_v15, %v1332_v15 }
 0x436   :  { %v568_v19 = vpop.xlane.xlu1 %567 }
 0x437   :  { %v570_v21 = vmul.f32 0.03125, %v568_v19  ;;  %580 = vadd.xlane.f32.xlu1 %v578_v17  ;;  %v665_v17 = vld [vmem:[%s1468_s12] sm:$0xff] }
 0x438   :  { %v855_v19 = vld [vmem:[%s1467_s11] ss:$0 sm:$0xff] }
 0x439   :  { %v575_v25 = vmul.f32 %v1329_v28, %v570_v21 }
 0x43b   :  { %v1337_v23 = vsub.f32 %v562_v3, %v575_v25 }
 0x43d   :  { %v579_v26 = vmul.f32 %v1337_v23, %v1337_v23 }
 0x43f   :  { %582 = vadd.xlane.f32.xlu0 %v579_v26 }
 0x4aa   :  { %v581_v43 = vpop.xlane.xlu1 %580 }
 0x4ab   :  { %v584_v44 = vmul.f32 0.03125, %v581_v43 }
 0x4ad   :  { %v586_v45 = vadd.f32 1e-05, %v584_v44 }
 0x4af   :  { %867 = vrsqrt.f32 %v586_v45  ;;  %vm594_vm10 = vweird.f32 %v586_v45 }
 0x4b2   :  { %v583_v49 = vpop.xlane.xlu0 %582 }
 0x4b3   :  { %v585_v50 = vmul.f32 0.03125, %v583_v49 }
 0x4b5   :  { %v868_v52 = vpop.eup %867  ;;  %v587_v53 = vadd.f32 1e-05, %v585_v50 }
 0x4b6   :  { %v589_v55 = vmul.f32 %v868_v52, %v586_v45  ;;  %vm595_vm9 = vweird.f32 %v868_v52 }
 0x4b7   :  { %869 = vrsqrt.f32 %v587_v53  ;;  %vm596_vm11 = vmor %vm594_vm10, %vm595_vm9  ;;  %vm604_vm13 = vweird.f32 %v587_v53 }
 0x4b8   :  { %v590_v57 = vmul.f32 %v868_v52, %v589_v55 }
 0x4ba   :  { %v591_v59 = vmul.f32 0.5, %v590_v57 }
 0x4bc   :  { %v592_v61 = vsub.f32 1.5, %v591_v59 }
 0x4bd   :  { %v870_v62 = vpop.eup %869 }
 0x4be   :  { %v593_v0 = vmul.f32 %v868_v52, %v592_v61  ;;  %v599_v1 = vmul.f32 %v870_v62, %v587_v53  ;;  %vm605_vm12 = vweird.f32 %v870_v62  ;;  %v857_v61 = vld [vmem:[%s1470_s14] ss:$0 sm:$0xff]  ;;  %s904_s14 = smov [#allocation2]  }
 0x4bf   :  { %vm606_vm14 = vmor %vm604_vm13, %vm605_vm12  ;;  %s770_s21 = sshll.u32 %s904_s14, 4  ;;  %s771_s21 = int_to_ptr.vmem [resolvable:$true] %s770_s21 }
 0x4c0   :  { %v597_v7 = vsel %vm596_vm11, %v868_v52, %v593_v0  ;;  %v600_v8 = vmul.f32 %v870_v62, %v599_v1  ;;  %v858_v1 = vld [vmem:[%s1471_s15] ss:$0 sm:$0xff]  ;;  %s905_s15 = smov 128  }
 0x4c1   :  { %v608_v9 = vmul.f32 %v597_v7, %v1332_v15  ;;  %v666_v15 = vld [vmem:[%s1468_s12 + $0x8] sm:$0xff] }
 0x4c2   :  { %v601_v16 = vmul.f32 0.5, %v600_v8  ;;  %699 = vmatpush.msrb.mxu3 %v666_v15 }
 0x4c3   :  { %v613_v18 = vmul.f32 %v853_v2, %v608_v9 }
 0x4c4   :  { %v602_v22 = vsub.f32 1.5, %v601_v16  ;;  %700 = vmatpush.msrb.mxu3 %v665_v17 }
 0x4c5   :  { %v618_v24 = vadd.f32 %v854_v12, %v613_v18 }
 0x4c6   :  { %v603_v3 = vmul.f32 %v870_v62, %v602_v22 }
 0x4c7   :  { %656 = vmatmul.f32.vlgmr.msrb.gmra.mxu2 %v618_v24 }
 0x4c8   :  { %v607_v5 = vsel %vm606_vm14, %v870_v62, %v603_v3 }
 0x4c9   :  { %v609_v10 = vmul.f32 %v607_v5, %v1337_v23 }
 0x4cb   :  { %v614_v11 = vmul.f32 %v853_v2, %v609_v10 }
 0x4cd   :  { %v619_v13 = vadd.f32 %v854_v12, %v614_v11 }
 0x4cf   :  { %659 = vmatmul.f32.gmra.mxu2 %v619_v13 }
 0x54a   :  { %v657_v21 = vpop.f32.mrf.mxu2 }
 0x54b   :  { %v658_v25 = vadd.f32 %v855_v19, %v657_v21 }
 0x54d   :  { %v663_v23 = vmax.f32 %v658_v25, 0.0 }
 0x54f   :  { %701 = vmatmul.f32.vlgmr.msrb.gmra.mxu3 %v663_v23 }
 0x552   :  { %v660_v26 = vpop.f32.mrf.mxu2 }
 0x553   :  { %v661_v27 = vadd.f32 %v855_v19, %v660_v26 }
 0x555   :  { %v664_v30 = vmax.f32 %v661_v27, 0.0 }
 0x557   :  { %704 = vmatmul.f32.gmra.mxu3 %v664_v30 }
 0x5d2   :  { %v702_v31 = vpop.f32.mrf.mxu3 }
 0x5d3   :  { %v703_v37 = vadd.f32 %v856_v41, %v702_v31 }
 0x5d5   :  { %v708_v32 = vadd.f32 %v703_v37, %v618_v24 }
 0x5d7   :  { %712 = vadd.xlane.f32.xlu1 %v708_v32 }
 0x5da   :  { %v705_v33 = vpop.f32.mrf.mxu3 }
 0x5db   :  { %v706_v34 = vadd.f32 %v856_v41, %v705_v33 }
 0x5dd   :  { %v709_v35 = vadd.f32 %v706_v34, %v619_v13 }
 0x5df   :  { %714 = vadd.xlane.f32.xlu1 %v709_v35 }
 0x64a   :  { %v713_v36 = vpop.xlane.xlu1 %712 }
 0x64b   :  { %v716_v38 = vmul.f32 0.03125, %v713_v36 }
 0x64d   :  { %v718_v39 = vmul.f32 %v1329_v28, %v716_v38 }
 0x64f   :  { %v720_v40 = vsub.f32 %v708_v32, %v718_v39 }
 0x651   :  { %v722_v42 = vmul.f32 %v720_v40, %v720_v40 }
 0x652   :  { %v715_v43 = vpop.xlane.xlu1 %714 }
 0x653   :  { %v717_v44 = vmul.f32 0.03125, %v715_v43  ;;  %724 = vadd.xlane.f32.xlu1 %v722_v42 }
 0x655   :  { %v719_v45 = vmul.f32 %v1329_v28, %v717_v44 }
 0x657   :  { %v721_v46 = vsub.f32 %v709_v35, %v719_v45 }
 0x659   :  { %v723_v47 = vmul.f32 %v721_v46, %v721_v46 }
 0x65b   :  { %726 = vadd.xlane.f32.xlu2 %v723_v47 }
 0x6c6   :  { %v725_v48 = vpop.xlane.xlu1 %724 }
 0x6c7   :  { %v728_v49 = vmul.f32 0.03125, %v725_v48 }
 0x6c9   :  { %v730_v50 = vadd.f32 1e-05, %v728_v49 }
 0x6cb   :  { %871 = vrsqrt.f32 %v730_v50  ;;  %vm738_vm0 = vweird.f32 %v730_v50 }
 0x6ce   :  { %v727_v51 = vpop.xlane.xlu2 %726 }
 0x6cf   :  { %v729_v52 = vmul.f32 0.03125, %v727_v51 }
 0x6d1   :  { %v872_v53 = vpop.eup %871  ;;  %v731_v54 = vadd.f32 1e-05, %v729_v52 }
 0x6d2   :  { %v733_v55 = vmul.f32 %v872_v53, %v730_v50  ;;  %vm739_vm15 = vweird.f32 %v872_v53 }
 0x6d3   :  { %873 = vrsqrt.f32 %v731_v54  ;;  %vm740_vm1 = vmor %vm738_vm0, %vm739_vm15  ;;  %vm748_vm3 = vweird.f32 %v731_v54 }
 0x6d4   :  { %v734_v56 = vmul.f32 %v872_v53, %v733_v55 }
 0x6d6   :  { %v735_v57 = vmul.f32 0.5, %v734_v56 }
 0x6d8   :  { %v736_v58 = vsub.f32 1.5, %v735_v57 }
 0x6d9   :  { %v874_v59 = vpop.eup %873 }
 0x6da   :  { %v737_v60 = vmul.f32 %v872_v53, %v736_v58  ;;  %v743_v28 = vmul.f32 %v874_v59, %v731_v54  ;;  %vm749_vm2 = vweird.f32 %v874_v59 }
 0x6db   :  { %vm750_vm4 = vmor %vm748_vm3, %vm749_vm2 }
 0x6dc   :  { %v741_v62 = vsel %vm740_vm1, %v872_v53, %v737_v60  ;;  %v744_v63 = vmul.f32 %v874_v59, %v743_v28 }
 0x6dd   :  { %v752_v0 = vmul.f32 %v741_v62, %v720_v40 }
 0x6de   :  { %v745_v2 = vmul.f32 0.5, %v744_v63 }
 0x6df   :  { %v757_v4 = vmul.f32 %v857_v61, %v752_v0 }
 0x6e0   :  { %v746_v7 = vsub.f32 1.5, %v745_v2 }
 0x6e1   :  { %v762_v8 = vadd.f32 %v858_v1, %v757_v4 }
 0x6e2   :  { %v747_v9 = vmul.f32 %v874_v59, %v746_v7 }
 0x6e3   :  { %764 = vst [vmem:[#allocation2] sm:$0xff] %v762_v8 }
 0x6e4   :  { %v751_v12 = vsel %vm750_vm4, %v874_v59, %v747_v9 }
 0x6e5   :  { %v753_v14 = vmul.f32 %v751_v12, %v721_v46 }
 0x6e7   :  { %v758_v16 = vmul.f32 %v857_v61, %v753_v14 }
 0x6e9   :  { %v763_v18 = vadd.f32 %v858_v1, %v758_v16 }
 0x6eb   :  { %765 = vst [vmem:[#allocation2 + $0x8] sm:$0xff] %v763_v18 }
 0x6ec   :  { %778 = dma.vmem_to_hbm [thread:$0]  %s771_s21, 256, %s773_s3, [#allocation3], %s905_s15, %s905_s15, %s906_s29  }
 0x6ed   :  { %899 = dma.done.wait [#allocation3], 256  }
 0x6ee   :  { %900 = vsyncadd [#allocation3], 4294967040 }
 0x6ef   :  { %783 = vsyncpa [#allocation3], 1 }

</bundles_post_ra>
